<compile_context>
chip_gen: v5e
topology: v5e:2x2
jax: 0.10.0
libtpu: 0.0.40
codegen_flags: <defaults>
</compile_context>

<pallas_src>
import functools

import jax
import jax.numpy as jnp
from jax.experimental import pallas as pl
from jax.experimental.pallas import tpu as pltpu

_EPS = 1e-6
_LANES = 128            # boxes per lane-row
_MAX_TILE_ROWS = 256    # 256 * 128 = 32768 boxes / grid step (~1.2 MiB inputs)
_CORE_SPLITS = 2        # leading "parallel" grid axis (sharded across TCs on v7x)


def _round_up(x, m):
    return ((x + m - 1) // m) * m


def _precise_recip(x):
    """EUP approx reciprocal + one Newton refinement (rel. err ~1e-7)."""
    r = pl.reciprocal(x, approx=True)
    return r * (2.0 - x * r)


def _iou_loss_kernel(pred_ref, tgt_ref, w_ref, loss_ref, wsum_ref,
                     loss_acc, w_acc, *, giou: bool):
    """Per-tile aligned IoU / GIoU loss with full-vreg operands.

    pred_ref/tgt_ref: (4, TR, 128) f32  -- coordinate planes x1,y1,x2,y2
    w_ref:            (1, TR, 128) f32  -- per-box weight
    loss_ref/wsum_ref:(1, 1, 1)   f32  -- per-core-split partial sums
    loss_acc/w_acc:   (TR, 128)   f32  -- VMEM scratch accumulators
    """
    i = pl.program_id(1)  # inner reduction axis

    @pl.when(i == 0)
    def _():
        loss_acc[...] = jnp.zeros_like(loss_acc)
        w_acc[...] = jnp.zeros_like(w_acc)

    px1 = pred_ref[0]
    py1 = pred_ref[1]
    px2 = pred_ref[2]
    py2 = pred_ref[3]
    tx1 = tgt_ref[0]
    ty1 = tgt_ref[1]
    tx2 = tgt_ref[2]
    ty2 = tgt_ref[3]

    # intersection
    iw = jnp.maximum(jnp.minimum(px2, tx2) - jnp.maximum(px1, tx1), 0.0)
    ih = jnp.maximum(jnp.minimum(py2, ty2) - jnp.maximum(py1, ty1), 0.0)
    overlap = iw * ih

    area1 = (px2 - px1) * (py2 - py1)
    area2 = (tx2 - tx1) * (ty2 - ty1)
    union = jnp.maximum(area1 + area2 - overlap, _EPS)
    iou = overlap * _precise_recip(union)

    if giou:  # static (compile-time) flag
        ew = jnp.maximum(jnp.maximum(px2, tx2) - jnp.minimum(px1, tx1), 0.0)
        eh = jnp.maximum(jnp.maximum(py2, ty2) - jnp.minimum(py1, ty1), 0.0)
        enclose = jnp.maximum(ew * eh, _EPS)
        iou = iou - (enclose - union) * _precise_recip(enclose)

    w = w_ref[0]
    loss_acc[...] += (1.0 - iou) * w
    w_acc[...] += w

    @pl.when(i == pl.num_programs(1) - 1)
    def _():
        loss_ref[...] = jnp.sum(loss_acc[...]).reshape(1, 1, 1)
        wsum_ref[...] = jnp.sum(w_acc[...]).reshape(1, 1, 1)


def _relayout(x, cols, rows_pad):
    """(N, cols) -> (cols, rows_pad, 128) zero-padded, lane-dense per coord."""
    # TODO(synk): ideally the producer emits this (cols, rows, 128) layout
    # directly so this extra HBM pass (pad + transpose) disappears.
    n = x.shape[0]
    x = x.reshape(n, cols).astype(jnp.float32)
    x = jnp.pad(x, ((0, rows_pad * _LANES - n), (0, 0)))
    x = x.reshape(rows_pad, _LANES, cols)
    return jnp.transpose(x, (2, 0, 1))


def _iou_loss_sums(pred, target, weight, *, giou: bool):
    """Returns (sum_i (1-iou_i)*w_i, sum_i w_i) for aligned boxes.

    pred/target: (N, 4) x1,y1,x2,y2 ; weight: (N, 1) or (N,).
    """
    n = pred.shape[0]
    rows = max(1, _round_up(n, _LANES) // _LANES)
    tile_rows = min(
        _MAX_TILE_ROWS,
        _round_up(-(-rows // _CORE_SPLITS), 8))          # multiple of 8
    rows_pad = _round_up(rows, _CORE_SPLITS * tile_rows)
    inner_tiles = rows_pad // (_CORE_SPLITS * tile_rows)

    pred_t = _relayout(pred, 4, rows_pad)
    tgt_t = _relayout(target, 4, rows_pad)
    w_t = _relayout(weight, 1, rows_pad)

    kernel = functools.partial(_iou_loss_kernel, giou=giou)

    def in_map(c, i):
        return (0, c * inner_tiles + i, 0)

    def out_map(c, i):
        return (c, 0, 0)

    loss_p, w_p = pl.pallas_call(
        kernel,
        out_shape=(jax.ShapeDtypeStruct((_CORE_SPLITS, 1, 1), jnp.float32),
                   jax.ShapeDtypeStruct((_CORE_SPLITS, 1, 1), jnp.float32)),
        grid_spec=pltpu.PrefetchScalarGridSpec(
            num_scalar_prefetch=0,
            grid=(_CORE_SPLITS, inner_tiles),
            in_specs=[
                pl.BlockSpec((4, tile_rows, _LANES), in_map),
                pl.BlockSpec((4, tile_rows, _LANES), in_map),
                pl.BlockSpec((1, tile_rows, _LANES), in_map),
            ],
            out_specs=[
                pl.BlockSpec((1, 1, 1), out_map),
                pl.BlockSpec((1, 1, 1), out_map),
            ],
            scratch_shapes=[
                pltpu.VMEM((tile_rows, _LANES), jnp.float32),
                pltpu.VMEM((tile_rows, _LANES), jnp.float32),
            ],
        ),
        compiler_params=pltpu.CompilerParams(
            dimension_semantics=("parallel", "arbitrary")),
    )(pred_t, tgt_t, w_t)

    return jnp.sum(loss_p), jnp.sum(w_p)


_iou_loss_sums_jit = jax.jit(_iou_loss_sums, static_argnames=("giou",))


def my_iou_loss(preds, targets, weights, *, reduction="mean",
                loss_weight=1.0, giou=False):
    """JAX/Pallas equivalent of MyIOULoss.forward (tensor or list-of-levels)."""
    assert reduction in ("mean", "sum")
    if not isinstance(preds, (list, tuple)):
        preds, targets, weights = [preds], [targets], [weights]

    # Fuse all FPN levels into one kernel launch (sums are level-additive).
    pred = jnp.concatenate([p.reshape(-1, 4) for p in preds], axis=0)
    target = jnp.concatenate([t.reshape(-1, 4) for t in targets], axis=0)
    weight = jnp.concatenate([w.reshape(-1, 1) for w in weights], axis=0)

    loss_bboxes, loss_num = _iou_loss_sums_jit(pred, target, weight, giou=giou)

    num = jnp.maximum(loss_num, 1.0)  # torch.clamp_min(loss_num, 1)
    if reduction == "mean":
        loss_bboxes = loss_bboxes / num
        show = dict(error=loss_bboxes)
    else:
        show = dict(error=loss_bboxes / num)
    return loss_bboxes * loss_weight, show


def _ref_loss(pred, target, weight, *, reduction="mean", loss_weight=1.0,
              giou=False):
    """Pure-JAX reference (mirrors mmdet bbox_overlaps is_aligned=True)."""
    lt = jnp.maximum(pred[:, :2], target[:, :2])
    rb = jnp.minimum(pred[:, 2:], target[:, 2:])
    wh = jnp.maximum(rb - lt, 0.0)
    overlap = wh[:, 0] * wh[:, 1]
    area1 = (pred[:, 2] - pred[:, 0]) * (pred[:, 3] - pred[:, 1])
    area2 = (target[:, 2] - target[:, 0]) * (target[:, 3] - target[:, 1])
    union = jnp.maximum(area1 + area2 - overlap, _EPS)
    iou = overlap / union
    if giou:
        elt = jnp.minimum(pred[:, :2], target[:, :2])
        erb = jnp.maximum(pred[:, 2:], target[:, 2:])
        ewh = jnp.maximum(erb - elt, 0.0)
        enc = jnp.maximum(ewh[:, 0] * ewh[:, 1], _EPS)
        iou = iou - (enc - union) / enc
    loss_bbox = (1.0 - iou)[:, None] * weight
    loss_sum = loss_bbox.sum()
    num = jnp.maximum(weight.sum(), 1.0)
    if reduction == "mean":
        loss_sum = loss_sum / num
    return loss_sum * loss_weight


def _make_boxes(key, n):
    k1, k2, k3 = jax.random.split(key, 3)
    xy = jax.random.uniform(k1, (n, 2), jnp.float32) * 10.0
    wh = jax.random.uniform(k2, (n, 2), jnp.float32) * 5.0 + 0.5
    boxes = jnp.concatenate([xy, xy + wh], axis=1)            # (n, 4) x1y1x2y2
    w = jax.random.uniform(k3, (n, 1), jnp.float32) + 0.5     # (n, 1)
    return boxes, w


if __name__ == "__main__":
    key = jax.random.PRNGKey(0)
    ka, kb, kc, kd = jax.random.split(key, 4)

    N = 10
    preds, _ = _make_boxes(ka, N)
    targets, weights = _make_boxes(kb, N)

    # single-tensor, IoU, mean
    loss, show = my_iou_loss(preds, targets, weights,
                             reduction="mean", loss_weight=1.0, giou=False)
    jax.block_until_ready(loss)
    ref = _ref_loss(preds, targets, weights, reduction="mean",
                    loss_weight=1.0, giou=False)
    assert jnp.allclose(loss, ref, rtol=1e-5, atol=1e-5), (loss, ref)

    # GIoU path
    loss_g, _ = my_iou_loss(preds, targets, weights, giou=True)
    ref_g = _ref_loss(preds, targets, weights, giou=True)
    jax.block_until_ready(loss_g)
    assert jnp.allclose(loss_g, ref_g, rtol=1e-5, atol=1e-5), (loss_g, ref_g)

    # list-of-levels input (fused into one pallas_call)
    N2 = 7
    preds2, _ = _make_boxes(kc, N2)
    targets2, weights2 = _make_boxes(kd, N2)
    loss_l, _ = my_iou_loss([preds, preds2], [targets, targets2],
                            [weights, weights2], reduction="mean",
                            loss_weight=2.0, giou=False)
    jax.block_until_ready(loss_l)
    ref_l = _ref_loss(jnp.concatenate([preds, preds2], 0),
                      jnp.concatenate([targets, targets2], 0),
                      jnp.concatenate([weights, weights2], 0),
                      reduction="mean", loss_weight=2.0, giou=False)
    assert jnp.allclose(loss_l, ref_l, rtol=1e-5, atol=1e-5), (loss_l, ref_l)

    print("KERNEL_OK")
</pallas_src>

<mosaic_0001>
module attributes {stable_mosaic.version = 11 : i64} {
  func.func @_iou_loss_kernel(%arg0: i32, %arg1: i32, %arg2: memref<4x8x128xf32, #tpu.memory_space<vmem>>, %arg3: memref<4x8x128xf32, #tpu.memory_space<vmem>>, %arg4: memref<1x8x128xf32, #tpu.memory_space<vmem>>, %arg5: memref<1x1x1xf32, #tpu.memory_space<vmem>>, %arg6: memref<1x1x1xf32, #tpu.memory_space<vmem>>, %arg7: memref<8x128xf32, #tpu.memory_space<vmem>>, %arg8: memref<8x128xf32, #tpu.memory_space<vmem>>) attributes {dimension_semantics = [#tpu.dimension_semantics<parallel>, #tpu.dimension_semantics<arbitrary>], iteration_bounds = array<i64: 2, 1>, scalar_prefetch = 0 : i64, scratch_operands = 2 : i64, tpu.core_type = #tpu.core_type<tc>, window_params = [{transform_indices = @transform_0, window_bounds = array<i64: 4, 8, 128>}, {transform_indices = @transform_1, window_bounds = array<i64: 4, 8, 128>}, {transform_indices = @transform_2, window_bounds = array<i64: 1, 8, 128>}, {transform_indices = @transform_3, window_bounds = array<i64: 1, 1, 1>}, {transform_indices = @transform_4, window_bounds = array<i64: 1, 1, 1>}]} {
    %c0_i32 = arith.constant 0 : i32
    %0 = arith.cmpi eq, %arg1, %c0_i32 : i32
    %1 = arith.extui %0 : i1 to i32
    %c0_i32_0 = arith.constant 0 : i32
    %2 = arith.cmpi ne, %1, %c0_i32_0 : i32
    scf.if %2 {
      %cst_38 = arith.constant 0.000000e+00 : f32
      %60 = vector.broadcast %cst_38 : f32 to vector<8x128xf32>
      %c0_39 = arith.constant 0 : index
      %c0_40 = arith.constant 0 : index
      %61 = vector.load %arg7[%c0_39, %c0_40] : memref<8x128xf32, #tpu.memory_space<vmem>>, vector<8x128xf32>
      tpu.vector_store %arg7[%c0_39, %c0_40], %60 {strides = array<i32>} : memref<8x128xf32, #tpu.memory_space<vmem>>, vector<8x128xf32>,
      %cst_41 = arith.constant 0.000000e+00 : f32
      %62 = vector.broadcast %cst_41 : f32 to vector<8x128xf32>
      %c0_42 = arith.constant 0 : index
      %c0_43 = arith.constant 0 : index
      %63 = vector.load %arg8[%c0_42, %c0_43] : memref<8x128xf32, #tpu.memory_space<vmem>>, vector<8x128xf32>
      tpu.vector_store %arg8[%c0_42, %c0_43], %62 {strides = array<i32>} : memref<8x128xf32, #tpu.memory_space<vmem>>, vector<8x128xf32>,
    } else {
    }
    %c0 = arith.constant 0 : index
    %c0_1 = arith.constant 0 : index
    %c0_2 = arith.constant 0 : index
    %3 = vector.load %arg2[%c0, %c0_1, %c0_2] : memref<4x8x128xf32, #tpu.memory_space<vmem>>, vector<1x8x128xf32>
    %4 = vector.shape_cast %3 : vector<1x8x128xf32> to vector<8x128xf32>
    %c1 = arith.constant 1 : index
    %c0_3 = arith.constant 0 : index
    %c0_4 = arith.constant 0 : index
    %5 = vector.load %arg2[%c1, %c0_3, %c0_4] : memref<4x8x128xf32, #tpu.memory_space<vmem>>, vector<1x8x128xf32>
    %6 = vector.shape_cast %5 : vector<1x8x128xf32> to vector<8x128xf32>
    %c2 = arith.constant 2 : index
    %c0_5 = arith.constant 0 : index
    %c0_6 = arith.constant 0 : index
    %7 = vector.load %arg2[%c2, %c0_5, %c0_6] : memref<4x8x128xf32, #tpu.memory_space<vmem>>, vector<1x8x128xf32>
    %8 = vector.shape_cast %7 : vector<1x8x128xf32> to vector<8x128xf32>
    %c3 = arith.constant 3 : index
    %c0_7 = arith.constant 0 : index
    %c0_8 = arith.constant 0 : index
    %9 = vector.load %arg2[%c3, %c0_7, %c0_8] : memref<4x8x128xf32, #tpu.memory_space<vmem>>, vector<1x8x128xf32>
    %10 = vector.shape_cast %9 : vector<1x8x128xf32> to vector<8x128xf32>
    %c0_9 = arith.constant 0 : index
    %c0_10 = arith.constant 0 : index
    %c0_11 = arith.constant 0 : index
    %11 = vector.load %arg3[%c0_9, %c0_10, %c0_11] : memref<4x8x128xf32, #tpu.memory_space<vmem>>, vector<1x8x128xf32>
    %12 = vector.shape_cast %11 : vector<1x8x128xf32> to vector<8x128xf32>
    %c1_12 = arith.constant 1 : index
    %c0_13 = arith.constant 0 : index
    %c0_14 = arith.constant 0 : index
    %13 = vector.load %arg3[%c1_12, %c0_13, %c0_14] : memref<4x8x128xf32, #tpu.memory_space<vmem>>, vector<1x8x128xf32>
    %14 = vector.shape_cast %13 : vector<1x8x128xf32> to vector<8x128xf32>
    %c2_15 = arith.constant 2 : index
    %c0_16 = arith.constant 0 : index
    %c0_17 = arith.constant 0 : index
    %15 = vector.load %arg3[%c2_15, %c0_16, %c0_17] : memref<4x8x128xf32, #tpu.memory_space<vmem>>, vector<1x8x128xf32>
    %16 = vector.shape_cast %15 : vector<1x8x128xf32> to vector<8x128xf32>
    %c3_18 = arith.constant 3 : index
    %c0_19 = arith.constant 0 : index
    %c0_20 = arith.constant 0 : index
    %17 = vector.load %arg3[%c3_18, %c0_19, %c0_20] : memref<4x8x128xf32, #tpu.memory_space<vmem>>, vector<1x8x128xf32>
    %18 = vector.shape_cast %17 : vector<1x8x128xf32> to vector<8x128xf32>
    %19 = arith.minimumf %8, %16 : vector<8x128xf32>
    %20 = arith.maximumf %4, %12 : vector<8x128xf32>
    %21 = arith.subf %19, %20 : vector<8x128xf32>
    %cst = arith.constant 0.000000e+00 : f32
    %22 = vector.broadcast %cst : f32 to vector<8x128xf32>
    %23 = arith.maximumf %21, %22 : vector<8x128xf32>
    %24 = arith.minimumf %10, %18 : vector<8x128xf32>
    %25 = arith.maximumf %6, %14 : vector<8x128xf32>
    %26 = arith.subf %24, %25 : vector<8x128xf32>
    %cst_21 = arith.constant 0.000000e+00 : f32
    %27 = vector.broadcast %cst_21 : f32 to vector<8x128xf32>
    %28 = arith.maximumf %26, %27 : vector<8x128xf32>
    %29 = arith.mulf %23, %28 : vector<8x128xf32>
    %30 = arith.subf %8, %4 : vector<8x128xf32>
    %31 = arith.subf %10, %6 : vector<8x128xf32>
    %32 = arith.mulf %30, %31 : vector<8x128xf32>
    %33 = arith.subf %16, %12 : vector<8x128xf32>
    %34 = arith.subf %18, %14 : vector<8x128xf32>
    %35 = arith.mulf %33, %34 : vector<8x128xf32>
    %36 = arith.addf %32, %35 : vector<8x128xf32>
    %37 = arith.subf %36, %29 : vector<8x128xf32>
    %cst_22 = arith.constant 9.99999997E-7 : f32
    %38 = vector.broadcast %cst_22 : f32 to vector<8x128xf32>
    %39 = arith.maximumf %37, %38 : vector<8x128xf32>
    %40 = tpu.reciprocal %39 {approx = true} : vector<8x128xf32> -> vector<8x128xf32>
    %41 = arith.mulf %39, %40 : vector<8x128xf32>
    %cst_23 = arith.constant 2.000000e+00 : f32
    %42 = vector.broadcast %cst_23 : f32 to vector<8x128xf32>
    %43 = arith.subf %42, %41 : vector<8x128xf32>
    %44 = arith.mulf %40, %43 : vector<8x128xf32>
    %45 = arith.mulf %29, %44 : vector<8x128xf32>
    %c0_24 = arith.constant 0 : index
    %c0_25 = arith.constant 0 : index
    %c0_26 = arith.constant 0 : index
    %46 = vector.load %arg4[%c0_24, %c0_25, %c0_26] : memref<1x8x128xf32, #tpu.memory_space<vmem>>, vector<1x8x128xf32>
    %47 = vector.shape_cast %46 : vector<1x8x128xf32> to vector<8x128xf32>
    %c0_27 = arith.constant 0 : index
    %c0_28 = arith.constant 0 : index
    %48 = vector.load %arg7[%c0_27, %c0_28] : memref<8x128xf32, #tpu.memory_space<vmem>>, vector<8x128xf32>
    %cst_29 = arith.constant 1.000000e+00 : f32
    %49 = vector.broadcast %cst_29 : f32 to vector<8x128xf32>
    %50 = arith.subf %49, %45 : vector<8x128xf32>
    %51 = arith.mulf %50, %47 : vector<8x128xf32>
    %52 = arith.addf %48, %51 : vector<8x128xf32>
    %c0_30 = arith.constant 0 : index
    %c0_31 = arith.constant 0 : index
    %53 = vector.load %arg7[%c0_30, %c0_31] : memref<8x128xf32, #tpu.memory_space<vmem>>, vector<8x128xf32>
    tpu.vector_store %arg7[%c0_30, %c0_31], %52 {strides = array<i32>} : memref<8x128xf32, #tpu.memory_space<vmem>>, vector<8x128xf32>,
    %c0_32 = arith.constant 0 : index
    %c0_33 = arith.constant 0 : index
    %54 = vector.load %arg8[%c0_32, %c0_33] : memref<8x128xf32, #tpu.memory_space<vmem>>, vector<8x128xf32>
    %55 = arith.addf %54, %47 : vector<8x128xf32>
    %c0_34 = arith.constant 0 : index
    %c0_35 = arith.constant 0 : index
    %56 = vector.load %arg8[%c0_34, %c0_35] : memref<8x128xf32, #tpu.memory_space<vmem>>, vector<8x128xf32>
    tpu.vector_store %arg8[%c0_34, %c0_35], %55 {strides = array<i32>} : memref<8x128xf32, #tpu.memory_space<vmem>>, vector<8x128xf32>,
    %c0_i32_36 = arith.constant 0 : i32
    %57 = arith.cmpi eq, %arg1, %c0_i32_36 : i32
    %58 = arith.extui %57 : i1 to i32
    %c0_i32_37 = arith.constant 0 : i32
    %59 = arith.cmpi ne, %58, %c0_i32_37 : i32
    scf.if %59 {
      %c0_38 = arith.constant 0 : index
      %c0_39 = arith.constant 0 : index
      %60 = vector.load %arg7[%c0_38, %c0_39] : memref<8x128xf32, #tpu.memory_space<vmem>>, vector<8x128xf32>
      %61 = vector.shape_cast %60 : vector<8x128xf32> to vector<1x8x128xf32>
      %cst_40 = arith.constant dense<0.000000e+00> : vector<1xf32>
      %62 = vector.multi_reduction <add>, %61, %cst_40 [1, 2] : vector<1x8x128xf32> to vector<1xf32>
      %63 = vector.shape_cast %62 : vector<1xf32> to vector<1x1x1xf32>
      %64 = vector.extract %63[0, 0, 0] : f32 from vector<1x1x1xf32>
      %65 = vector.broadcast %64 : f32 to vector<1x1x1xf32>
      %c0_41 = arith.constant 0 : index
      %c0_42 = arith.constant 0 : index
      %c0_43 = arith.constant 0 : index
      %66 = vector.load %arg5[%c0_41, %c0_42, %c0_43] : memref<1x1x1xf32, #tpu.memory_space<vmem>>, vector<1x1x1xf32>
      tpu.vector_store %arg5[%c0_41, %c0_42, %c0_43], %65 {strides = array<i32>} : memref<1x1x1xf32, #tpu.memory_space<vmem>>, vector<1x1x1xf32>,
      %c0_44 = arith.constant 0 : index
      %c0_45 = arith.constant 0 : index
      %67 = vector.load %arg8[%c0_44, %c0_45] : memref<8x128xf32, #tpu.memory_space<vmem>>, vector<8x128xf32>
      %68 = vector.shape_cast %67 : vector<8x128xf32> to vector<1x8x128xf32>
      %cst_46 = arith.constant dense<0.000000e+00> : vector<1xf32>
      %69 = vector.multi_reduction <add>, %68, %cst_46 [1, 2] : vector<1x8x128xf32> to vector<1xf32>
      %70 = vector.shape_cast %69 : vector<1xf32> to vector<1x1x1xf32>
      %71 = vector.extract %70[0, 0, 0] : f32 from vector<1x1x1xf32>
      %72 = vector.broadcast %71 : f32 to vector<1x1x1xf32>
      %c0_47 = arith.constant 0 : index
      %c0_48 = arith.constant 0 : index
      %c0_49 = arith.constant 0 : index
      %73 = vector.load %arg6[%c0_47, %c0_48, %c0_49] : memref<1x1x1xf32, #tpu.memory_space<vmem>>, vector<1x1x1xf32>
      tpu.vector_store %arg6[%c0_47, %c0_48, %c0_49], %72 {strides = array<i32>} : memref<1x1x1xf32, #tpu.memory_space<vmem>>, vector<1x1x1xf32>,
    } else {
    }
    return
  }
  func.func @transform_0(%arg0: i32, %arg1: i32) -> (i32, i32, i32) {
    %c1_i32 = arith.constant 1 : i32
    %0 = arith.muli %arg0, %c1_i32 : i32
    %1 = arith.addi %0, %arg1 : i32
    %c0_i32 = arith.constant 0 : i32
    %c0_i32_0 = arith.constant 0 : i32
    %c0_i32_1 = arith.constant 0 : i32
    return %c0_i32, %1, %c0_i32_0 : i32, i32, i32
  }
  func.func @transform_1(%arg0: i32, %arg1: i32) -> (i32, i32, i32) {
    %c1_i32 = arith.constant 1 : i32
    %0 = arith.muli %arg0, %c1_i32 : i32
    %1 = arith.addi %0, %arg1 : i32
    %c0_i32 = arith.constant 0 : i32
    %c0_i32_0 = arith.constant 0 : i32
    %c0_i32_1 = arith.constant 0 : i32
    return %c0_i32, %1, %c0_i32_0 : i32, i32, i32
  }
  func.func @transform_2(%arg0: i32, %arg1: i32) -> (i32, i32, i32) {
    %c1_i32 = arith.constant 1 : i32
    %0 = arith.muli %arg0, %c1_i32 : i32
    %1 = arith.addi %0, %arg1 : i32
    %c0_i32 = arith.constant 0 : i32
    %c0_i32_0 = arith.constant 0 : i32
    %c0_i32_1 = arith.constant 0 : i32
    return %c0_i32, %1, %c0_i32_0 : i32, i32, i32
  }
  func.func @transform_3(%arg0: i32, %arg1: i32) -> (i32, i32, i32) {
    %c0_i32 = arith.constant 0 : i32
    %c0_i32_0 = arith.constant 0 : i32
    %c0_i32_1 = arith.constant 0 : i32
    return %arg0, %c0_i32, %c0_i32_0 : i32, i32, i32
  }
  func.func @transform_4(%arg0: i32, %arg1: i32) -> (i32, i32, i32) {
    %c0_i32 = arith.constant 0 : i32
    %c0_i32_0 = arith.constant 0 : i32
    %c0_i32_1 = arith.constant 0 : i32
    return %arg0, %c0_i32, %c0_i32_0 : i32, i32, i32
  }
}

</mosaic_0001>

<bundles_post_ra>
// kernel: _iou_loss_sums.1
= control target key start
LH: loop header
LB: loop body
LE: loop exit
PB: predicated region body
PF: predicated region fallthrough
CT: control target
= control target key end

     0   :  { %s690_s15 = smov 0   ;;  %s692_s16 = smov 0   ;;  %s780_s0 = inlined_call_operand.vmem [shape: f32[4,16,128], index: 0, kind: input, shape index: {}]   ;;  %s781_s1 = inlined_call_operand.vmem [shape: f32[4,16,128], index: 1, kind: input, shape index: {}]   ;;  %s782_s2 = inlined_call_operand.vmem [shape: f32[1,16,128], index: 2, kind: input, shape index: {}]   ;;  %s783_s3 = inlined_call_operand.vmem [shape: f32[2,1,1], index: 3, kind: output, shape index: {0}]   ;;  %s784_s4 = inlined_call_operand.vmem [shape: f32[2,1,1], index: 4, kind: output, shape index: {1}]  }
   0x1   :  { %s694_s17 = smov 0   ;;  %s696_s18 = smov 0  }
   0x2   :  { %s698_s19 = smov 0  }
   0x3 LB: > { %s27_s20 = sadd.s32 1, %s659_s18  ;;  %p43_p1 = scmp.ne.s32.totalorder %s651_s16, %s647_s15  ;;  %s663_s19 = sphi %s698_s19, %s15_s19   ;;  %s659_s18 = sphi %s696_s18, %s789_s18   ;;  %s655_s17 = sphi %s694_s17, %s788_s17   ;;  %s651_s16 = sphi %s692_s16, %s787_s16   ;;  %s647_s15 = sphi %s690_s15, %s786_s15  }
   0x4   : > { %p29_p0 = scmp.ge.s32.totalorder %s27_s20, 2  ;;  %p44_p2 = scmp.eq.s32.totalorder %s663_s19, 0 }
   0x5   : > { %s36_s23 = sadd.s32 1, %s651_s16  ;;  %p562_p5 = scmp.ge.s32.totalorder %s663_s19, 2 }
   0x6   : > { %s791_s20 = smov (%p29_p0, %s27_s20), 0  ;;  %p721_p3 = por %p44_p2, %p43_p1 }
   0x7   : > { %s33_s22 = ssub.s32 %s659_s18, %s791_s20  ;;  %177 = sbr.rel (%p562_p5) target bundleno = 28 (0x1c), region = 16 }
   0x8   : > { %p34_p4 = scmp.eq.s32.totalorder %s33_s22, 0 }
   0xa   : > { %s729_s24 = scalar_select %p34_p4, %s651_s16, %s36_s23  }
   0xc   : > { %180 = sbr.rel (!%p721_p3) target bundleno = 20 (0x14), region = 20  ;;  %s182_s25 = sand.u32 (%p721_p3), 1, %s651_s16  }
   0xd   : > { %s564_s26 = sshll.u32 (%p721_p3), %s659_s18, 3  ;;  %s563_s27 = sshll.u32 (%p721_p3), %s182_s25, 5 }
   0xe   : > { %s187_s30 = scalar_lea.vmem (%p721_p3), %s780_s0, %s564_s26  ;;  %s184_s5 = scalar_lea.vmem (%p721_p3), [#allocation4], %s563_s27 }
   0xf   : > { %v222_v0 = vld [vmem:[%s187_s30] sm:$0xff] (%p721_p3)  ;;  %v224_v1 = vld [vmem:[%s187_s30 + $0x10] sm:$0xff] (%p721_p3) }
  0x10   : > { %v226_v2 = vld [vmem:[%s187_s30 + $0x20] sm:$0xff] (%p721_p3)  ;;  %223 = vst [vmem:[%s184_s5] sm:$0xff] (%p721_p3), %v222_v0  ;;  %v228_v3 = vld [vmem:[%s187_s30 + $0x30] sm:$0xff] (%p721_p3) }
  0x11   : > { %225 = vst [vmem:[%s184_s5 + $0x8] sm:$0xff] %v224_v1 }
  0x12   : > { %227 = vst [vmem:[%s184_s5 + $0x10] sm:$0xff] %v226_v2 }
  0x13   : > { %229 = vst [vmem:[%s184_s5 + $0x18] sm:$0xff] %v228_v3 }
  0x14 PF: > { %235 = sbr.rel (!%p721_p3) target bundleno = 28 (0x1c), region = 58  ;;  %s237_s6 = sand.u32 (%p721_p3), 1, %s651_s16  }
  0x15   : > { %s566_s7 = sshll.u32 (%p721_p3), %s659_s18, 3  ;;  %s565_s8 = sshll.u32 (%p721_p3), %s237_s6, 5 }
  0x16   : > { %s242_s11 = scalar_lea.vmem (%p721_p3), %s781_s1, %s566_s7  ;;  %s239_s12 = scalar_lea.vmem (%p721_p3), [#allocation5], %s565_s8 }
  0x17   : > { %v277_v4 = vld [vmem:[%s242_s11] sm:$0xff] (%p721_p3)  ;;  %v279_v5 = vld [vmem:[%s242_s11 + $0x10] sm:$0xff] (%p721_p3) }
  0x18   : > { %v281_v6 = vld [vmem:[%s242_s11 + $0x20] sm:$0xff] (%p721_p3)  ;;  %278 = vst [vmem:[%s239_s12] sm:$0xff] (%p721_p3), %v277_v4  ;;  %v283_v7 = vld [vmem:[%s242_s11 + $0x30] sm:$0xff] (%p721_p3) }
  0x19   : > { %280 = vst [vmem:[%s239_s12 + $0x8] sm:$0xff] %v279_v5 }
  0x1a   : > { %282 = vst [vmem:[%s239_s12 + $0x10] sm:$0xff] %v281_v6 }
  0x1b   : > { %284 = vst [vmem:[%s239_s12 + $0x18] sm:$0xff] %v283_v7 }
  0x1c PF: > { %p567_p6 = scmp.ge.s32.totalorder %s663_s19, 1  ;;  %p298_p7 = scmp.lt.s32.totalorder %s663_s19, 3 }
  0x1e   : > { %p299_p8 = pnand %p567_p6, %p298_p7 }
  0x1f   : > { %s305_s13 = sand.u32 (!%p299_p8), 1, %s647_s15   ;;  %p350_p9 = scmp.lt.s32.totalorder (!%p299_p8), %s655_s17, 1 }
  0x20   : > { %302 = sbr.rel (%p299_p8) target bundleno = 259 (0x103), region = 100  ;;  %s568_s14 = sshll.u32 (!%p299_p8), %s305_s13, 5 }
  0x21   : > { %s307_s21 = scalar_lea.vmem (!%p299_p8), [#allocation4], %s568_s14  ;;  %s314_s22 = scalar_lea.vmem (!%p299_p8), [#allocation5], %s568_s14 }
  0x25   : > { %v367_v8 = vld [vmem:[%s307_s21] sm:$0xff]  ;;  %v571_v9 = vld [vmem:[%s307_s21 + $0x8] sm:$0xff]  ;;  %v572_v10 = vld [vmem:[%s307_s21 + $0x10] sm:$0xff]  ;;  %s793_s17 = smov (!%p350_p9, %s655_s17), 1  ;;  %vm427_vm0 = vcmask 0  }
  0x26   : > { %v573_v11 = vld [vmem:[%s307_s21 + $0x18] sm:$0xff]  ;;  %v374_v12 = vld [vmem:[%s314_s22] sm:$0xff]  ;;  %v574_v13 = vld [vmem:[%s314_s22 + $0x8] sm:$0xff]  ;;  %v390_v14 = vsub.f32 %v572_v10, %v367_v8  ;;  %s570_s15 = sshll.u32 %s793_s17, 3  ;;  %s357_s29 = scalar_lea.vmem %s783_s3, %s793_s17 }
  0x27   : > { %v575_v15 = vld [vmem:[%s314_s22 + $0x10] sm:$0xff]  ;;  %v576_v16 = vld [vmem:[%s314_s22 + $0x18] sm:$0xff]  ;;  %v382_v17 = vmax.f32 %v367_v8, %v374_v12  ;;  %v386_v18 = vmax.f32 %v571_v9, %v574_v13  ;;  %v391_v19 = vsub.f32 %v573_v11, %v571_v9  ;;  %s353_s26 = scalar_lea.vmem %s782_s2, %s570_s15  ;;  %s360_s7 = scalar_lea.vmem %s784_s4, %s793_s17 }
  0x28   : > { %v381_v20 = vmin.f32 %v572_v10, %v575_v15  ;;  %v385_v21 = vmin.f32 %v573_v11, %v576_v16  ;;  %v393_v22 = vsub.f32 %v575_v15, %v374_v12  ;;  %v394_v23 = vsub.f32 %v576_v16, %v574_v13  ;;  %v404_v39 = vld [vmem:[%s353_s26] sm:$0xff] }
  0x29   : > { %v392_v24 = vmul.f32 %v391_v19, %v390_v14 }
  0x2a   : > { %v383_v25 = vsub.f32 %v381_v20, %v382_v17  ;;  %v387_v26 = vsub.f32 %v385_v21, %v386_v18  ;;  %v395_v27 = vmul.f32 %v394_v23, %v393_v22 }
  0x2c   : > { %v384_v28 = vmax.f32 %v383_v25, 0.0  ;;  %v388_v29 = vmax.f32 %v387_v26, 0.0  ;;  %v396_v30 = vadd.f32 %v395_v27, %v392_v24 }
  0x2e   : > { %v389_v31 = vmul.f32 %v388_v29, %v384_v28 }
  0x30   : > { %v397_v32 = vsub.f32 %v396_v30, %v389_v31 }
  0x32   : > { %v398_v33 = vmax.f32 %v397_v32, 1e-06 }
  0x34   : > { %623 = vrcp.f32 %v398_v33 }
  0x3a   : > { %v624_v34 = vpop.eup %623 }
  0x3b   : > { %v400_v35 = vmul.f32 %v624_v34, %v398_v33 }
  0x3d   : > { %v401_v36 = vsub.f32 2.0, %v400_v35 }
  0x3f   : > { %v402_v37 = vmul.f32 %v624_v34, %v401_v36 }
  0x41   : > { %v403_v38 = vmul.f32 %v402_v37, %v389_v31 }
  0x43   : > { %v406_v40 = vsub.f32 1.0, %v403_v38 }
  0x45   : > { %v407_v41 = vmul.f32 %v406_v40, %v404_v39 }
  0x47   : > { %417 = vadd.xlane.f32.xlu0 %v407_v41 }
  0x4f   : > { %430 = vadd.xlane.f32.xlu0 %v404_v39 }
  0xba   : > { %v418_v42 = vpop.xlane.xlu0 %417 }
  0xbb   : > { %v419_v43 = vrot.slane %v418_v42, 4 }
  0xbd   : > { %v420_v44 = vadd.f32 %v419_v43, %v418_v42 }
  0xbf   : > { %v421_v45 = vrot.slane %v420_v44, 2 }
  0xc1   : > { %v422_v46 = vadd.f32 %v421_v45, %v420_v44 }
  0xc2   : > { %v431_v47 = vpop.xlane.xlu0 %430 }
  0xc3   : > { %v432_v48 = vrot.slane %v431_v47, 4  ;;  %v423_v49 = vrot.slane %v422_v46, 1 }
  0xc5   : > { %v433_v50 = vadd.f32 %v432_v48, %v431_v47  ;;  %v424_v51 = vadd.f32 %v423_v49, %v422_v46 }
  0xc7   : > { %v434_v52 = vrot.slane %v433_v50, 2  ;;  %579 = vpush %v424_v51 }
  0xc9   : > { %v435_v53 = vadd.f32 %v434_v52, %v433_v50 }
  0xcb   : > { %v436_v54 = vrot.slane %v435_v53, 1 }
  0xcd   : > { %v437_v55 = vadd.f32 %v436_v54, %v435_v53 }
  0xcf   : > { %581 = vpush %v437_v55 }
  0xf8   : > { %s580_s30 = spop %579 }
  0xf9   : > { %v426_v56 = vstv %s580_s30 }
  0xfa   : > { %428 = vst.msk [vmem:[%s357_s29] sm:$0x1] %vm427_vm0, %v426_v56 }
 0x100   : > { %s582_s8 = spop %581 }
 0x101   : > { %v439_v57 = vstv %s582_s8 }
 0x102   : > { %440 = vst.msk [vmem:[%s360_s7] sm:$0x1] %vm427_vm0, %v439_v57 }
 0x103 PF: > { %s15_s19 = sadd.s32 1, %s663_s19   ;;  %s786_s15 = smov %s651_s16 }
 0x104   : > { %p12_p10 = scmp.ge.s32.totalorder %s15_s19, 4   ;;  %s787_s16 = smov %s729_s24 }
 0x105   : > { %s788_s17 = smov %s659_s18  ;;  %s789_s18 = smov %s791_s20 }
 0x106   :  { %14 = sbr.rel (!%p12_p10) target bundleno = 3 (0x3), region = 180 }

</bundles_post_ra>
